<compile_context>
chip_gen: v7x
topology: tpu7x:2x2x1
jax: 0.10.0
libtpu: 0.0.40
codegen_flags: <defaults>
</compile_context>

<pallas_src>
import functools

import jax
import jax.numpy as jnp
from jax.experimental import pallas as pl
from jax.experimental.pallas import tpu as pltpu

HIDDEN = 256
BN_EPS = 1e-5


def _round_up(x, m):
    return ((x + m - 1) // m) * m


def _generator_kernel(
    x_ref,
    w1_ref, g1_ref, be1_ref,
    w2_ref, g2_ref, be2_ref,
    w3_ref, b3_ref,
    out_ref,
    *, real_batch, padded_batch,
):
    inv_n = jnp.float32(1.0 / real_batch)

    if padded_batch != real_batch:
        row = jax.lax.broadcasted_iota(jnp.int32, (padded_batch, 1), 0)
        row_mask = row < real_batch
    else:
        row_mask = None

    def bn_relu(h, g_ref, be_ref):
        # Padded rows of h are exactly zero (linear bias dropped), so plain
        # sums divided by the real batch give the true batch statistics.
        mu = jnp.sum(h, axis=0, keepdims=True) * inv_n
        ex2 = jnp.sum(h * h, axis=0, keepdims=True) * inv_n
        var = jnp.maximum(ex2 - mu * mu, 0.0)
        scale = g_ref[...] * jax.lax.rsqrt(var + BN_EPS)      # (1, H) row
        shift = be_ref[...] - mu * scale                      # (1, H) row
        h = jnp.maximum(h * scale + shift, 0.0)               # fused scale/shift
        if row_mask is not None:
            # Keep padded rows zero so the next layer's BN stats stay exact.
            h = jnp.where(row_mask, h, 0.0)
        return h

    # ---- Linear 1 (bf16 MXU, f32 accum) + BN + ReLU ----
    h = jnp.dot(x_ref[...], w1_ref[...], preferred_element_type=jnp.float32)
    h = bn_relu(h, g1_ref, be1_ref)

    # ---- Linear 2 + BN + ReLU ----
    h = jnp.dot(h.astype(jnp.bfloat16), w2_ref[...],
                preferred_element_type=jnp.float32)
    h = bn_relu(h, g2_ref, be2_ref)

    # ---- Linear 3 (bias kept: no BN after it) ----
    out = jnp.dot(h.astype(jnp.bfloat16), w3_ref[...],
                  preferred_element_type=jnp.float32)
    out_ref[...] = (out + b3_ref[...]).astype(out_ref.dtype)


def generator_forward(x, params):
    """Runs the full MLP in one Pallas call (everything resident in VMEM)."""
    batch, input_dim = x.shape
    data_dim = params["w3"].shape[1]

    # Pad M to full MXU row tiles, K / N to lane-dense multiples of 128.
    b_pad = _round_up(max(batch, 1), 128)
    k_pad = _round_up(input_dim, 128)
    n_pad = _round_up(data_dim, 128)

    # Zero-pad and cast matmul operands to bf16 (halves their DMA bytes,
    # doubles MXU throughput); BN/affine params stay f32.
    x_p = jnp.zeros((b_pad, k_pad), jnp.bfloat16).at[:batch, :input_dim].set(
        x.astype(jnp.bfloat16))
    w1_p = jnp.zeros((k_pad, HIDDEN), jnp.bfloat16).at[:input_dim, :].set(
        params["w1"].astype(jnp.bfloat16))
    w2_p = params["w2"].astype(jnp.bfloat16)
    w3_p = jnp.zeros((HIDDEN, n_pad), jnp.bfloat16).at[:, :data_dim].set(
        params["w3"].astype(jnp.bfloat16))
    b3_p = jnp.zeros((1, n_pad), jnp.float32).at[:, :data_dim].set(params["b3"])

    args = (
        x_p,
        w1_p, params["g1"], params["be1"],
        w2_p, params["g2"], params["be2"],
        w3_p, b3_p,
    )

    # Actual VMEM footprint + headroom for activations / compiler scratch.
    arg_bytes = sum(int(a.size) * a.dtype.itemsize for a in args)
    out_bytes = b_pad * n_pad * 4
    act_bytes = 2 * b_pad * HIDDEN * 4
    vmem_limit = min(32 << 20, max(2 * (arg_bytes + out_bytes + act_bytes),
                                   4 << 20))

    vmem_spec = pl.BlockSpec(memory_space=pltpu.MemorySpace.VMEM)

    kernel = functools.partial(
        _generator_kernel, real_batch=batch, padded_batch=b_pad)

    out_padded = pl.pallas_call(
        kernel,
        out_shape=jax.ShapeDtypeStruct((b_pad, n_pad), jnp.float32),
        in_specs=[vmem_spec] * len(args),
        out_specs=vmem_spec,
        compiler_params=pltpu.CompilerParams(vmem_limit_bytes=vmem_limit),
    )(*args)

    return out_padded[:batch, :data_dim]


def init_params(key, input_dim, data_dim):
    """Deterministic synthetic parameters matching the module's shapes."""
    k1, k2, k3, k4, k5, k6 = jax.random.split(key, 6)
    scale = 0.05
    return {
        # Linear(input_dim, 256)  (biases non-zero to exercise BN cancellation)
        "w1": scale * jax.random.normal(k1, (input_dim, HIDDEN), jnp.float32),
        "b1": scale * jax.random.normal(k4, (1, HIDDEN), jnp.float32),
        # BatchNorm1d(256): gamma=1, beta=0 (PyTorch default init)
        "g1": jnp.ones((1, HIDDEN), jnp.float32),
        "be1": jnp.zeros((1, HIDDEN), jnp.float32),
        # Linear(256, 256)
        "w2": scale * jax.random.normal(k2, (HIDDEN, HIDDEN), jnp.float32),
        "b2": scale * jax.random.normal(k5, (1, HIDDEN), jnp.float32),
        # BatchNorm1d(256)
        "g2": jnp.ones((1, HIDDEN), jnp.float32),
        "be2": jnp.zeros((1, HIDDEN), jnp.float32),
        # Linear(256, data_dim)
        "w3": scale * jax.random.normal(k3, (HIDDEN, data_dim), jnp.float32),
        "b3": scale * jax.random.normal(k6, (1, data_dim), jnp.float32),
    }


def _reference_forward(x, p):
    """Pure-JAX f32 reference mirroring the PyTorch module (training-mode BN,
    biases included — they cancel under the batch mean subtraction)."""
    h = x @ p["w1"] + p["b1"]
    mu = jnp.mean(h, axis=0, keepdims=True)
    var = jnp.mean((h - mu) ** 2, axis=0, keepdims=True)
    h = jnp.maximum((h - mu) / jnp.sqrt(var + BN_EPS) * p["g1"] + p["be1"], 0.0)
    h = h @ p["w2"] + p["b2"]
    mu = jnp.mean(h, axis=0, keepdims=True)
    var = jnp.mean((h - mu) ** 2, axis=0, keepdims=True)
    h = jnp.maximum((h - mu) / jnp.sqrt(var + BN_EPS) * p["g2"] + p["be2"], 0.0)
    return h @ p["w3"] + p["b3"]


if __name__ == "__main__":
    key = jax.random.PRNGKey(0)
    kx, kp = jax.random.split(key)

    batch, input_dim, data_dim = 8, 32, 16
    x = jax.random.normal(kx, (batch, input_dim), jnp.float32)
    params = init_params(kp, input_dim, data_dim)

    out = generator_forward(x, params)
    out = jax.block_until_ready(out)

    ref = _reference_forward(x, params)
    assert out.shape == (batch, data_dim)
    # bf16 MXU inputs (f32 accumulation) -> compare to the f32 reference with
    # a tolerance that covers bf16 rounding of the matmul operands.
    assert jnp.allclose(out, ref, atol=5e-2, rtol=5e-2), (
        float(jnp.max(jnp.abs(out - ref))))

    print("KERNEL_OK")
</pallas_src>

<mosaic_0001>
module attributes {stable_mosaic.version = 11 : i64} {
  func.func @_generator_kernel(%arg0: memref<128x128xbf16, #tpu.memory_space<vmem>>, %arg1: memref<128x256xbf16, #tpu.memory_space<vmem>>, %arg2: memref<1x256xf32, #tpu.memory_space<vmem>>, %arg3: memref<1x256xf32, #tpu.memory_space<vmem>>, %arg4: memref<256x256xbf16, #tpu.memory_space<vmem>>, %arg5: memref<1x256xf32, #tpu.memory_space<vmem>>, %arg6: memref<1x256xf32, #tpu.memory_space<vmem>>, %arg7: memref<256x128xbf16, #tpu.memory_space<vmem>>, %arg8: memref<1x128xf32, #tpu.memory_space<vmem>>, %arg9: memref<128x128xf32, #tpu.memory_space<vmem>>) attributes {dimension_semantics = [], scalar_prefetch = 0 : i64, scratch_operands = 0 : i64, tpu.core_type = #tpu.core_type<tc>} {
    %0 = tpu.iota {dimensions = array<i32: 0>} : vector<128x1xi32>
    %c8_i32 = arith.constant 8 : i32
    %1 = vector.broadcast %c8_i32 : i32 to vector<128x1xi32>
    %2 = arith.cmpi slt, %0, %1 : vector<128x1xi32>
    %c0 = arith.constant 0 : index
    %c0_0 = arith.constant 0 : index
    %3 = vector.load %arg0[%c0, %c0_0] : memref<128x128xbf16, #tpu.memory_space<vmem>>, vector<128x128xbf16>
    %c0_1 = arith.constant 0 : index
    %c0_2 = arith.constant 0 : index
    %4 = vector.load %arg1[%c0_1, %c0_2] : memref<128x256xbf16, #tpu.memory_space<vmem>>, vector<128x256xbf16>
    %cst = arith.constant dense<0.000000e+00> : vector<128x256xf32>
    %5 = tpu.matmul %3, %4, %cst {dimension_numbers = #tpu.dot_dimension_numbers<[1], [0], [0], [1], [0, 0, 1, 1], [], []>} : vector<128x128xbf16>, vector<128x256xbf16>, vector<128x256xf32> -> vector<128x256xf32>
    %cst_3 = arith.constant dense<0.000000e+00> : vector<256xf32>
    %6 = vector.multi_reduction <add>, %5, %cst_3 [0] : vector<128x256xf32> to vector<256xf32>
    %7 = vector.shape_cast %6 : vector<256xf32> to vector<1x256xf32>
    %cst_4 = arith.constant 1.250000e-01 : f32
    %8 = vector.broadcast %cst_4 : f32 to vector<1x256xf32>
    %9 = arith.mulf %7, %8 : vector<1x256xf32>
    %10 = arith.mulf %5, %5 : vector<128x256xf32>
    %cst_5 = arith.constant dense<0.000000e+00> : vector<256xf32>
    %11 = vector.multi_reduction <add>, %10, %cst_5 [0] : vector<128x256xf32> to vector<256xf32>
    %12 = vector.shape_cast %11 : vector<256xf32> to vector<1x256xf32>
    %cst_6 = arith.constant 1.250000e-01 : f32
    %13 = vector.broadcast %cst_6 : f32 to vector<1x256xf32>
    %14 = arith.mulf %12, %13 : vector<1x256xf32>
    %15 = arith.mulf %9, %9 : vector<1x256xf32>
    %16 = arith.subf %14, %15 : vector<1x256xf32>
    %cst_7 = arith.constant 0.000000e+00 : f32
    %17 = vector.broadcast %cst_7 : f32 to vector<1x256xf32>
    %18 = arith.maximumf %16, %17 : vector<1x256xf32>
    %c0_8 = arith.constant 0 : index
    %c0_9 = arith.constant 0 : index
    %19 = vector.load %arg2[%c0_8, %c0_9] : memref<1x256xf32, #tpu.memory_space<vmem>>, vector<1x256xf32>
    %cst_10 = arith.constant 9.99999974E-6 : f32
    %20 = vector.broadcast %cst_10 : f32 to vector<1x256xf32>
    %21 = arith.addf %18, %20 : vector<1x256xf32>
    %22 = math.rsqrt %21 : vector<1x256xf32>
    %23 = arith.mulf %19, %22 : vector<1x256xf32>
    %c0_11 = arith.constant 0 : index
    %c0_12 = arith.constant 0 : index
    %24 = vector.load %arg3[%c0_11, %c0_12] : memref<1x256xf32, #tpu.memory_space<vmem>>, vector<1x256xf32>
    %25 = arith.mulf %9, %23 : vector<1x256xf32>
    %26 = arith.subf %24, %25 : vector<1x256xf32>
    %27 = vector.broadcast %23 : vector<1x256xf32> to vector<128x256xf32>
    %28 = arith.mulf %5, %27 : vector<128x256xf32>
    %29 = vector.broadcast %26 : vector<1x256xf32> to vector<128x256xf32>
    %30 = arith.addf %28, %29 : vector<128x256xf32>
    %cst_13 = arith.constant 0.000000e+00 : f32
    %31 = vector.broadcast %cst_13 : f32 to vector<128x256xf32>
    %32 = arith.maximumf %30, %31 : vector<128x256xf32>
    %cst_14 = arith.constant 0.000000e+00 : f32
    %33 = vector.shape_cast %2 : vector<128x1xi1> to vector<128x1xi1>
    %34 = vector.broadcast %33 : vector<128x1xi1> to vector<128x256xi1>
    %35 = vector.broadcast %cst_14 : f32 to vector<128x256xf32>
    %36 = arith.select %34, %32, %35 : vector<128x256xi1>, vector<128x256xf32>
    %37 = arith.truncf %36 : vector<128x256xf32> to vector<128x256xbf16>
    %c0_15 = arith.constant 0 : index
    %c0_16 = arith.constant 0 : index
    %38 = vector.load %arg4[%c0_15, %c0_16] : memref<256x256xbf16, #tpu.memory_space<vmem>>, vector<256x256xbf16>
    %cst_17 = arith.constant dense<0.000000e+00> : vector<128x256xf32>
    %39 = tpu.matmul %37, %38, %cst_17 {dimension_numbers = #tpu.dot_dimension_numbers<[1], [0], [0], [1], [0, 0, 1, 1], [], []>} : vector<128x256xbf16>, vector<256x256xbf16>, vector<128x256xf32> -> vector<128x256xf32>
    %cst_18 = arith.constant dense<0.000000e+00> : vector<256xf32>
    %40 = vector.multi_reduction <add>, %39, %cst_18 [0] : vector<128x256xf32> to vector<256xf32>
    %41 = vector.shape_cast %40 : vector<256xf32> to vector<1x256xf32>
    %cst_19 = arith.constant 1.250000e-01 : f32
    %42 = vector.broadcast %cst_19 : f32 to vector<1x256xf32>
    %43 = arith.mulf %41, %42 : vector<1x256xf32>
    %44 = arith.mulf %39, %39 : vector<128x256xf32>
    %cst_20 = arith.constant dense<0.000000e+00> : vector<256xf32>
    %45 = vector.multi_reduction <add>, %44, %cst_20 [0] : vector<128x256xf32> to vector<256xf32>
    %46 = vector.shape_cast %45 : vector<256xf32> to vector<1x256xf32>
    %cst_21 = arith.constant 1.250000e-01 : f32
    %47 = vector.broadcast %cst_21 : f32 to vector<1x256xf32>
    %48 = arith.mulf %46, %47 : vector<1x256xf32>
    %49 = arith.mulf %43, %43 : vector<1x256xf32>
    %50 = arith.subf %48, %49 : vector<1x256xf32>
    %cst_22 = arith.constant 0.000000e+00 : f32
    %51 = vector.broadcast %cst_22 : f32 to vector<1x256xf32>
    %52 = arith.maximumf %50, %51 : vector<1x256xf32>
    %c0_23 = arith.constant 0 : index
    %c0_24 = arith.constant 0 : index
    %53 = vector.load %arg5[%c0_23, %c0_24] : memref<1x256xf32, #tpu.memory_space<vmem>>, vector<1x256xf32>
    %cst_25 = arith.constant 9.99999974E-6 : f32
    %54 = vector.broadcast %cst_25 : f32 to vector<1x256xf32>
    %55 = arith.addf %52, %54 : vector<1x256xf32>
    %56 = math.rsqrt %55 : vector<1x256xf32>
    %57 = arith.mulf %53, %56 : vector<1x256xf32>
    %c0_26 = arith.constant 0 : index
    %c0_27 = arith.constant 0 : index
    %58 = vector.load %arg6[%c0_26, %c0_27] : memref<1x256xf32, #tpu.memory_space<vmem>>, vector<1x256xf32>
    %59 = arith.mulf %43, %57 : vector<1x256xf32>
    %60 = arith.subf %58, %59 : vector<1x256xf32>
    %61 = vector.broadcast %57 : vector<1x256xf32> to vector<128x256xf32>
    %62 = arith.mulf %39, %61 : vector<128x256xf32>
    %63 = vector.broadcast %60 : vector<1x256xf32> to vector<128x256xf32>
    %64 = arith.addf %62, %63 : vector<128x256xf32>
    %cst_28 = arith.constant 0.000000e+00 : f32
    %65 = vector.broadcast %cst_28 : f32 to vector<128x256xf32>
    %66 = arith.maximumf %64, %65 : vector<128x256xf32>
    %cst_29 = arith.constant 0.000000e+00 : f32
    %67 = vector.shape_cast %2 : vector<128x1xi1> to vector<128x1xi1>
    %68 = vector.broadcast %67 : vector<128x1xi1> to vector<128x256xi1>
    %69 = vector.broadcast %cst_29 : f32 to vector<128x256xf32>
    %70 = arith.select %68, %66, %69 : vector<128x256xi1>, vector<128x256xf32>
    %71 = arith.truncf %70 : vector<128x256xf32> to vector<128x256xbf16>
    %c0_30 = arith.constant 0 : index
    %c0_31 = arith.constant 0 : index
    %72 = vector.load %arg7[%c0_30, %c0_31] : memref<256x128xbf16, #tpu.memory_space<vmem>>, vector<256x128xbf16>
    %cst_32 = arith.constant dense<0.000000e+00> : vector<128x128xf32>
    %73 = tpu.matmul %71, %72, %cst_32 {dimension_numbers = #tpu.dot_dimension_numbers<[1], [0], [0], [1], [0, 0, 1, 1], [], []>} : vector<128x256xbf16>, vector<256x128xbf16>, vector<128x128xf32> -> vector<128x128xf32>
    %c0_33 = arith.constant 0 : index
    %c0_34 = arith.constant 0 : index
    %74 = vector.load %arg8[%c0_33, %c0_34] : memref<1x128xf32, #tpu.memory_space<vmem>>, vector<1x128xf32>
    %75 = vector.broadcast %74 : vector<1x128xf32> to vector<128x128xf32>
    %76 = arith.addf %73, %75 : vector<128x128xf32>
    %c0_35 = arith.constant 0 : index
    %c0_36 = arith.constant 0 : index
    %77 = vector.load %arg9[%c0_35, %c0_36] : memref<128x128xf32, #tpu.memory_space<vmem>>, vector<128x128xf32>
    tpu.vector_store %arg9[%c0_35, %c0_36], %76 {strides = array<i32>} : memref<128x128xf32, #tpu.memory_space<vmem>>, vector<128x128xf32>,
    return
  }
}

</mosaic_0001>

<bundles_post_ra>
// kernel: tpu_custom_call.1
= control target key start
LH: loop header
LB: loop body
LE: loop exit
PB: predicated region body
PF: predicated region fallthrough
CT: control target
= control target key end

     0   :  { %14 = vsyncpa [#allocation3], 0  ;;  %s2319_s0 = inlined_call_operand.hbm [shape: bf16[128,128], index: 0, kind: input, shape index: {}]   ;;  %s2320_s1 = inlined_call_operand.hbm [shape: bf16[128,256], index: 1, kind: input, shape index: {}]   ;;  %s2321_s2 = inlined_call_operand.vmem [shape: f32[1,256], index: 2, kind: input, shape index: {}]   ;;  %s2322_s3 = inlined_call_operand.vmem [shape: f32[1,256], index: 3, kind: input, shape index: {}]   ;;  %s2323_s4 = inlined_call_operand.hbm [shape: bf16[256,256], index: 4, kind: input, shape index: {}]   ;;  %s2324_s5 = inlined_call_operand.vmem [shape: f32[1,256], index: 5, kind: input, shape index: {}]   ;;  %s2325_s6 = inlined_call_operand.vmem [shape: f32[1,256], index: 6, kind: input, shape index: {}]   ;;  %s2326_s7 = inlined_call_operand.hbm [shape: bf16[256,128], index: 7, kind: input, shape index: {}]   ;;  %s2327_s8 = inlined_call_operand.vmem [shape: f32[1,128], index: 8, kind: input, shape index: {}]   ;;  %s2328_s9 = inlined_call_operand.hbm [shape: f32[128,128], index: 9, kind: output, shape index: {}]  }
   0x1   :  { %15 = vsyncpa [#allocation6], 0 }
   0x2   :  { %16 = vsyncpa [#allocation9], 0 }
   0x3   :  { %17 = vsyncpa [#allocation4], 0  ;;  %s2063_s30 = smov [#allocation5]   ;;  %s1945_s13 = scalar_lea.hbm %s2320_s1, 2048 }
   0x4   :  { %s35_s10 = sshll.u32 %s2063_s30, 4  ;;  %p1946_p0 = scmp.ne.s32.totalorder %s2320_s1, %s1945_s13  ;;  %s36_s10 = int_to_ptr.vmem [resolvable:$true] %s35_s10 }
   0x5   :  { %p1949_p1 = scmp.lt.u32.totalorder %s1945_s13, %s2320_s1 }
   0x7   :  { %p1951_p2 = pnand %p1949_p1, %p1946_p0 }
   0x9   :  { %1954 = shalt.err (!%p1951_p2)
}
   0xa   :  { %s1955_s18 = scalar_lea.vmem %s36_s10, 2048  ;;  %p1960_p4 = scmp.lt.s32.totalorder %s36_s10, %s36_s10 }
   0xb   :  { %p1956_p3 = scmp.ne.s32.totalorder %s36_s10, %s1955_s18  ;;  %p1961_p5 = scmp.lt.s32.totalorder %s1955_s18, %s1955_s18 }
   0xd   :  { %p1962_p6 = por %p1961_p5, %p1960_p4 }
   0xf   :  { %p1963_p7 = pnand %p1962_p6, %p1956_p3 }
  0x11   :  { %1966 = shalt.err (!%p1963_p7)
}
  0x12   :  { %s2064_s19 = smov 128   ;;  %s2065_s20 = smov 8  }
  0x13   :  { %41 = dma.hbm_to_vmem [thread:$0]  %s2320_s1, 2048, %s36_s10, [#allocation6], %s2064_s19, %s2064_s19, %s2065_s20  }
  0x14   :  { %s2066_s23 = smov [#allocation2]   ;;  %s1967_s27 = scalar_lea.hbm %s2319_s0, 1024 }
  0x15   :  { %s23_s24 = sshll.u32 %s2066_s23, 4  ;;  %p1968_p8 = scmp.ne.s32.totalorder %s2319_s0, %s1967_s27  ;;  %s24_s24 = int_to_ptr.vmem [resolvable:$true] %s23_s24 }
  0x16   :  { %p1971_p9 = scmp.lt.u32.totalorder %s1967_s27, %s2319_s0 }
  0x18   :  { %p1973_p10 = pnand %p1971_p9, %p1968_p8 }
  0x1a   :  { %1976 = shalt.err (!%p1973_p10)
}
  0x1b   :  { %s1977_s12 = scalar_lea.vmem %s24_s24, 1024  ;;  %p1982_p12 = scmp.lt.s32.totalorder %s24_s24, %s24_s24 }
  0x1c   :  { %p1978_p11 = scmp.ne.s32.totalorder %s24_s24, %s1977_s12  ;;  %p1983_p13 = scmp.lt.s32.totalorder %s1977_s12, %s1977_s12 }
  0x1e   :  { %p1984_p0 = por %p1983_p13, %p1982_p12 }
  0x20   :  { %p1985_p1 = pnand %p1984_p0, %p1978_p11 }
  0x22   :  { %1988 = shalt.err (!%p1985_p1)
}
  0x23   :  { %s2067_s1 = smov 64   ;;  %s2068_s10 = smov 4  }
  0x24   :  { %29 = dma.hbm_to_vmem [thread:$0]  %s2319_s0, 1024, %s24_s24, [#allocation3], %s2067_s1, %s2067_s1, %s2068_s10  }
  0x25   :  { %s2069_s15 = smov [#allocation7]   ;;  %s2070_s17 = smov [#allocation8]  }
  0x26   :  { %s51_s16 = sshll.u32 %s2069_s15, 4  ;;  %s67_s18 = sshll.u32 %s2070_s17, 4  ;;  %s52_s16 = int_to_ptr.vmem [resolvable:$true] %s51_s16  ;;  %s2156_s18 = int_to_ptr.vmem [resolvable:$true] %s67_s18 }
  0x27   :  { %s1989_s23 = scalar_lea.hbm %s2323_s4, 4096 }
  0x28   :  { %p1990_p2 = scmp.ne.s32.totalorder %s2323_s4, %s1989_s23  ;;  %p1993_p3 = scmp.lt.u32.totalorder %s1989_s23, %s2323_s4 }
  0x2a   :  { %p1995_p4 = pnand %p1993_p3, %p1990_p2 }
  0x2c   :  { %1998 = shalt.err (!%p1995_p4)
}
  0x2d   :  { %s1999_s0 = scalar_lea.vmem %s52_s16, 4096  ;;  %p2004_p6 = scmp.lt.s32.totalorder %s52_s16, %s52_s16 }
  0x2e   :  { %p2000_p5 = scmp.ne.s32.totalorder %s52_s16, %s1999_s0  ;;  %p2005_p7 = scmp.lt.s32.totalorder %s1999_s0, %s1999_s0 }
  0x30   :  { %p2006_p8 = por %p2005_p7, %p2004_p6 }
  0x32   :  { %p2007_p9 = pnand %p2006_p8, %p2000_p5 }
  0x34   :  { %2010 = shalt.err (!%p2007_p9)
}
  0x35   :  { %57 = dma.hbm_to_vmem [thread:$0]  %s2323_s4, 4096, %s52_s16, [#allocation6], %s2064_s19, %s2064_s19, %s2065_s20  }
  0x36   :  { %s2011_s12 = scalar_lea.hbm %s2326_s7, 2048 }
  0x37   :  { %p2012_p10 = scmp.ne.s32.totalorder %s2326_s7, %s2011_s12  ;;  %p2015_p11 = scmp.lt.u32.totalorder %s2011_s12, %s2326_s7 }
  0x39   :  { %p2017_p12 = pnand %p2015_p11, %p2012_p10 }
  0x3b   :  { %2020 = shalt.err (!%p2017_p12)
}
  0x3c   :  { %s2021_s21 = scalar_lea.vmem %s2156_s18, 2048  ;;  %p2026_p0 = scmp.lt.s32.totalorder %s2156_s18, %s2156_s18 }
  0x3d   :  { %p2022_p13 = scmp.ne.s32.totalorder %s2156_s18, %s2021_s21  ;;  %p2027_p1 = scmp.lt.s32.totalorder %s2021_s21, %s2021_s21 }
  0x3f   :  { %p2028_p2 = por %p2027_p1, %p2026_p0 }
  0x41   :  { %p2029_p3 = pnand %p2028_p2, %p2022_p13 }
  0x43   :  { %2032 = shalt.err (!%p2029_p3)
}
  0x44   :  { %73 = dma.hbm_to_vmem [thread:$0]  %s2326_s7, 2048, %s2156_s18, [#allocation9], %s2067_s1, %s2067_s1, %s2068_s10  }
  0x45   :  { %2055 = dma.done.wait [#allocation3], 1024  }
  0x46   :  { %2056 = vsyncadd [#allocation3], 4294966272 }
  0x47   :  { %2057 = dma.done.wait [#allocation6], 6144  }
  0x48   :  { %2058 = vsyncadd [#allocation6], 4294961152 }
  0x49   :  { %2059 = dma.done.wait [#allocation9], 2048  }
  0x4a   :  { %2060 = vsyncadd [#allocation9], 4294965248  ;;  %v2071_v0 = vmov 0   ;;  %v1841_v1 = vld [vmem:[#allocation5 + $0x4] ss:$8 sps:$4 sm:$0xff]   ;;  %v1867_v19 = vld [vmem:[#allocation2 + $0x10] sm:$0xff]  }
  0x4b   :  { %314 = vmatprep.mubr.bf16.mxu0 %v2071_v0  ;;  %v1843_v2 = vld [vmem:[#allocation5] ss:$8 sps:$4 sm:$0xff]   ;;  %282 = vmatprep.subr.bf16.mxu0 %v1841_v1  ;;  %v1844_v3 = vld [vmem:[#allocation5 + $0x14] ss:$8 sps:$4 sm:$0xff]   ;;  %v1846_v4 = vld [vmem:[#allocation5 + $0x10] ss:$8 sps:$4 sm:$0xff]  }
  0x4c   :  { %283 = vmatpush1.bf16.msra.mxu0 %v1843_v2  ;;  %v1847_v5 = vld [vmem:[#allocation5 + $0x24] ss:$8 sps:$4 sm:$0xff]   ;;  %v1849_v6 = vld [vmem:[#allocation5 + $0x20] ss:$8 sps:$4 sm:$0xff]   ;;  %v1850_v7 = vld [vmem:[#allocation5 + $0x34] ss:$8 sps:$4 sm:$0xff]  }
  0x4d   :  { %284 = vmatprep.subr.bf16.mxu0 %v1844_v3  ;;  %v1852_v8 = vld [vmem:[#allocation5 + $0x30] ss:$8 sps:$4 sm:$0xff]   ;;  %v1853_v9 = vld [vmem:[#allocation5 + $0x44] ss:$8 sps:$4 sm:$0xff]   ;;  %v1855_v10 = vld [vmem:[#allocation5 + $0x40] ss:$8 sps:$4 sm:$0xff]  }
  0x4e   :  { %v1856_v11 = vld [vmem:[#allocation5 + $0x54] ss:$8 sps:$4 sm:$0xff]   ;;  %v1858_v12 = vld [vmem:[#allocation5 + $0x50] ss:$8 sps:$4 sm:$0xff]   ;;  %v1859_v13 = vld [vmem:[#allocation5 + $0x64] ss:$8 sps:$4 sm:$0xff]  }
  0x4f   :  { %v1861_v14 = vld [vmem:[#allocation5 + $0x60] ss:$8 sps:$4 sm:$0xff]   ;;  %v1862_v15 = vld [vmem:[#allocation5 + $0x74] ss:$8 sps:$4 sm:$0xff]   ;;  %v1864_v16 = vld [vmem:[#allocation5 + $0x70] ss:$8 sps:$4 sm:$0xff]  }
  0x50   :  { %285 = vmatpush1.bf16.msra.mxu0 %v1846_v4  ;;  %v1865_v17 = vld [vmem:[#allocation2] sm:$0xff]   ;;  %v1866_v18 = vld [vmem:[#allocation2 + $0x8] sm:$0xff]   ;;  %v1868_v20 = vld [vmem:[#allocation2 + $0x18] sm:$0xff]  }
  0x51   :  { %286 = vmatprep.subr.bf16.mxu0 %v1847_v5  ;;  %v1869_v21 = vld [vmem:[#allocation2 + $0x20] sm:$0xff]   ;;  %v1870_v22 = vld [vmem:[#allocation2 + $0x28] sm:$0xff]   ;;  %v1871_v23 = vld [vmem:[#allocation2 + $0x30] sm:$0xff]  }
  0x52   :  { %v1872_v24 = vld [vmem:[#allocation2 + $0x38] sm:$0xff]   ;;  %v1873_v25 = vld [vmem:[#allocation7 + $0x4] ss:$8 sps:$4 sm:$0xff]   ;;  %v1875_v26 = vld [vmem:[#allocation7] ss:$8 sps:$4 sm:$0xff]  }
  0x53   :  { %957 = vmatprep.subr.bf16.mxu1 %v1873_v25  ;;  %v1876_v27 = vld [vmem:[#allocation7 + $0x14] ss:$8 sps:$4 sm:$0xff]   ;;  %v1878_v28 = vld [vmem:[#allocation7 + $0x10] ss:$8 sps:$4 sm:$0xff]   ;;  %v1879_v29 = vld [vmem:[#allocation7 + $0x24] ss:$8 sps:$4 sm:$0xff]  }
  0x54   :  { %287 = vmatpush1.bf16.msra.mxu0 %v1849_v6  ;;  %958 = vmatpush1.bf16.msra.mxu1 %v1875_v26  ;;  %v1881_v30 = vld [vmem:[#allocation7 + $0x20] ss:$8 sps:$4 sm:$0xff]   ;;  %v1882_v31 = vld [vmem:[#allocation7 + $0x34] ss:$8 sps:$4 sm:$0xff]   ;;  %v1884_v32 = vld [vmem:[#allocation7 + $0x30] ss:$8 sps:$4 sm:$0xff]  }
  0x55   :  { %288 = vmatprep.subr.bf16.mxu0 %v1850_v7  ;;  %959 = vmatprep.subr.bf16.mxu1 %v1876_v27  ;;  %v1885_v33 = vld [vmem:[#allocation7 + $0x44] ss:$8 sps:$4 sm:$0xff]   ;;  %v1887_v34 = vld [vmem:[#allocation7 + $0x40] ss:$8 sps:$4 sm:$0xff]   ;;  %v1888_v35 = vld [vmem:[#allocation7 + $0x54] ss:$8 sps:$4 sm:$0xff]  }
  0x56   :  { %v1890_v36 = vld [vmem:[#allocation7 + $0x50] ss:$8 sps:$4 sm:$0xff]   ;;  %v1891_v37 = vld [vmem:[#allocation7 + $0x64] ss:$8 sps:$4 sm:$0xff]   ;;  %v1893_v38 = vld [vmem:[#allocation7 + $0x60] ss:$8 sps:$4 sm:$0xff]  }
  0x57   :  { %v1894_v39 = vld [vmem:[#allocation7 + $0x74] ss:$8 sps:$4 sm:$0xff]   ;;  %v1896_v40 = vld [vmem:[#allocation7 + $0x70] ss:$8 sps:$4 sm:$0xff]   ;;  %v1897_v41 = vld [vmem:[#allocation7 + $0x84] ss:$8 sps:$4 sm:$0xff]  }
  0x58   :  { %289 = vmatpush1.bf16.msra.mxu0 %v1852_v8  ;;  %960 = vmatpush1.bf16.msra.mxu1 %v1878_v28  ;;  %v1899_v42 = vld [vmem:[#allocation7 + $0x80] ss:$8 sps:$4 sm:$0xff]   ;;  %v1900_v43 = vld [vmem:[#allocation7 + $0x94] ss:$8 sps:$4 sm:$0xff]   ;;  %v1902_v44 = vld [vmem:[#allocation7 + $0x90] ss:$8 sps:$4 sm:$0xff]  }
  0x59   :  { %290 = vmatprep.subr.bf16.mxu0 %v1853_v9  ;;  %961 = vmatprep.subr.bf16.mxu1 %v1879_v29  ;;  %v1903_v45 = vld [vmem:[#allocation7 + $0xa4] ss:$8 sps:$4 sm:$0xff]   ;;  %v1905_v46 = vld [vmem:[#allocation7 + $0xa0] ss:$8 sps:$4 sm:$0xff]   ;;  %v1906_v47 = vld [vmem:[#allocation7 + $0xb4] ss:$8 sps:$4 sm:$0xff]  }
  0x5a   :  { %v1908_v48 = vld [vmem:[#allocation7 + $0xb0] ss:$8 sps:$4 sm:$0xff]   ;;  %v1909_v49 = vld [vmem:[#allocation7 + $0xc4] ss:$8 sps:$4 sm:$0xff]   ;;  %v1911_v50 = vld [vmem:[#allocation7 + $0xc0] ss:$8 sps:$4 sm:$0xff]  }
  0x5b   :  { %v1912_v51 = vld [vmem:[#allocation7 + $0xd4] ss:$8 sps:$4 sm:$0xff]   ;;  %v1914_v52 = vld [vmem:[#allocation7 + $0xd0] ss:$8 sps:$4 sm:$0xff]   ;;  %v1915_v53 = vld [vmem:[#allocation7 + $0xe4] ss:$8 sps:$4 sm:$0xff]  }
  0x5c   :  { %291 = vmatpush1.bf16.msra.mxu0 %v1855_v10  ;;  %962 = vmatpush1.bf16.msra.mxu1 %v1881_v30  ;;  %v1917_v54 = vld [vmem:[#allocation7 + $0xe0] ss:$8 sps:$4 sm:$0xff]   ;;  %v1918_v55 = vld [vmem:[#allocation7 + $0xf4] ss:$8 sps:$4 sm:$0xff]   ;;  %v1920_v56 = vld [vmem:[#allocation7 + $0xf0] ss:$8 sps:$4 sm:$0xff]  }
  0x5d   :  { %292 = vmatprep.subr.bf16.mxu0 %v1856_v11  ;;  %963 = vmatprep.subr.bf16.mxu1 %v1882_v31 }
  0x60   :  { %293 = vmatpush1.bf16.msra.mxu0 %v1858_v12  ;;  %964 = vmatpush1.bf16.msra.mxu1 %v1884_v32 }
  0x61   :  { %294 = vmatprep.subr.bf16.mxu0 %v1859_v13  ;;  %965 = vmatprep.subr.bf16.mxu1 %v1885_v33 }
  0x64   :  { %295 = vmatpush1.bf16.msra.mxu0 %v1861_v14  ;;  %966 = vmatpush1.bf16.msra.mxu1 %v1887_v34 }
  0x65   :  { %296 = vmatprep.subr.bf16.mxu0 %v1862_v15  ;;  %967 = vmatprep.subr.bf16.mxu1 %v1888_v35 }
  0x68   :  { %297 = vmatpush1.bf16.msra.mxu0 %v1864_v16  ;;  %968 = vmatpush1.bf16.msra.mxu1 %v1890_v36 }
  0x69   :  { %969 = vmatprep.subr.bf16.mxu1 %v1891_v37 }
  0x6b   :  { %315 = vmatmul.mubr.bf16.vlgmr.msra.gmra.mrb[0].mxu0 %v1865_v17 }
  0x6c   :  { %324 = vmatprep.mubr.bf16.mxu0 %v2071_v0  ;;  %970 = vmatpush1.bf16.msra.mxu1 %v1893_v38 }
  0x6d   :  { %971 = vmatprep.subr.bf16.mxu1 %v1894_v39 }
  0x70   :  { %972 = vmatpush1.bf16.msra.mxu1 %v1896_v40 }
  0x71   :  { %973 = vmatprep.subr.bf16.mxu1 %v1897_v41 }
  0x73   :  { %325 = vmatmul.mubr.bf16.gmra.mrb[4].mxu0 %v1866_v18 }
  0x74   :  { %334 = vmatprep.mubr.bf16.mxu0 %v2071_v0  ;;  %974 = vmatpush1.bf16.msra.mxu1 %v1899_v42 }
  0x75   :  { %975 = vmatprep.subr.bf16.mxu1 %v1900_v43 }
  0x78   :  { %976 = vmatpush1.bf16.msra.mxu1 %v1902_v44 }
  0x79   :  { %977 = vmatprep.subr.bf16.mxu1 %v1903_v45 }
  0x7b   :  { %335 = vmatmul.mubr.bf16.gmra.mrb[8].mxu0 %v1867_v19 }
  0x7c   :  { %344 = vmatprep.mubr.bf16.mxu0 %v2071_v0  ;;  %978 = vmatpush1.bf16.msra.mxu1 %v1905_v46 }
  0x7d   :  { %979 = vmatprep.subr.bf16.mxu1 %v1906_v47 }
  0x80   :  { %980 = vmatpush1.bf16.msra.mxu1 %v1908_v48 }
  0x81   :  { %981 = vmatprep.subr.bf16.mxu1 %v1909_v49 }
  0x83   :  { %345 = vmatmul.mubr.bf16.gmra.mrb[12].mxu0 %v1868_v20 }
  0x84   :  { %354 = vmatprep.mubr.bf16.mxu0 %v2071_v0  ;;  %982 = vmatpush1.bf16.msra.mxu1 %v1911_v50 }
  0x85   :  { %983 = vmatprep.subr.bf16.mxu1 %v1912_v51 }
  0x88   :  { %984 = vmatpush1.bf16.msra.mxu1 %v1914_v52 }
  0x89   :  { %985 = vmatprep.subr.bf16.mxu1 %v1915_v53 }
  0x8b   :  { %355 = vmatmul.mubr.bf16.gmra.mrb[16].mxu0 %v1869_v21 }
  0x8c   :  { %364 = vmatprep.mubr.bf16.mxu0 %v2071_v0  ;;  %986 = vmatpush1.bf16.msra.mxu1 %v1917_v54 }
  0x8d   :  { %987 = vmatprep.subr.bf16.mxu1 %v1918_v55 }
  0x90   :  { %988 = vmatpush1.bf16.msra.mxu1 %v1920_v56 }
  0x93   :  { %365 = vmatmul.mubr.bf16.gmra.mrb[20].mxu0 %v1870_v22 }
  0x94   :  { %374 = vmatprep.mubr.bf16.mxu0 %v2071_v0 }
  0x9b   :  { %375 = vmatmul.mubr.bf16.gmra.mrb[24].mxu0 %v1871_v23 }
  0x9c   :  { %384 = vmatprep.mubr.bf16.mxu0 %v2071_v0 }
  0xa3   :  { %385 = vmatmul.mubr.bf16.gmra.mrb[28].mxu0 %v1872_v24 }
 0x13e   :  { %v2193_v57 = vpop.f32.mrb[0].mxu0 }
 0x13f   :  { %v2195_v58 = vpop.f32.mrb[1].mxu0  ;;  %v439_v60 = vmul.f32 %v2193_v57, %v2193_v57 }
 0x140   :  { %v320_v59 = vpop.f32.mrb[2].mxu0  ;;  %v440_v0 = vmul.f32 %v2195_v58, %v2195_v58 }
 0x141   :  { %v395_v61 = vadd.f32 %v320_v59, %v2193_v57  ;;  %v441_v62 = vmul.f32 %v320_v59, %v320_v59  ;;  %v322_v63 = vpop.f32.mrb[3].mxu0 }
 0x142   :  { %v416_v1 = vadd.f32 %v322_v63, %v2195_v58  ;;  %v442_v2 = vmul.f32 %v322_v63, %v322_v63 }
 0x143   :  { %v471_v3 = vadd.f32 %v441_v62, %v439_v60 }
 0x144   :  { %v492_v4 = vadd.f32 %v442_v2, %v440_v0 }
 0x146   :  { %v326_v5 = vpop.f32.mrb[4].mxu0 }
 0x147   :  { %v396_v6 = vadd.f32 %v395_v61, %v326_v5  ;;  %v443_v7 = vmul.f32 %v326_v5, %v326_v5  ;;  %v328_v8 = vpop.f32.mrb[5].mxu0 }
 0x148   :  { %v417_v9 = vadd.f32 %v416_v1, %v328_v8  ;;  %v444_v10 = vmul.f32 %v328_v8, %v328_v8  ;;  %v330_v11 = vpop.f32.mrb[6].mxu0 }
 0x149   :  { %v472_v12 = vadd.f32 %v471_v3, %v443_v7  ;;  %v397_v13 = vadd.f32 %v396_v6, %v330_v11  ;;  %v445_v14 = vmul.f32 %v330_v11, %v330_v11  ;;  %v332_v15 = vpop.f32.mrb[7].mxu0 }
 0x14a   :  { %v493_v16 = vadd.f32 %v492_v4, %v444_v10  ;;  %v418_v17 = vadd.f32 %v417_v9, %v332_v15  ;;  %v446_v18 = vmul.f32 %v332_v15, %v332_v15 }
 0x14b   :  { %v473_v19 = vadd.f32 %v472_v12, %v445_v14 }
 0x14c   :  { %v494_v20 = vadd.f32 %v493_v16, %v446_v18 }
 0x14e   :  { %v336_v21 = vpop.f32.mrb[8].mxu0 }
 0x14f   :  { %v398_v22 = vadd.f32 %v397_v13, %v336_v21  ;;  %v447_v23 = vmul.f32 %v336_v21, %v336_v21  ;;  %v338_v24 = vpop.f32.mrb[9].mxu0 }
 0x150   :  { %v419_v25 = vadd.f32 %v418_v17, %v338_v24  ;;  %v448_v26 = vmul.f32 %v338_v24, %v338_v24  ;;  %v340_v27 = vpop.f32.mrb[10].mxu0 }
 0x151   :  { %v474_v28 = vadd.f32 %v473_v19, %v447_v23  ;;  %v399_v29 = vadd.f32 %v398_v22, %v340_v27  ;;  %v449_v30 = vmul.f32 %v340_v27, %v340_v27  ;;  %v342_v31 = vpop.f32.mrb[11].mxu0 }
 0x152   :  { %v495_v32 = vadd.f32 %v494_v20, %v448_v26  ;;  %v420_v33 = vadd.f32 %v419_v25, %v342_v31  ;;  %v450_v34 = vmul.f32 %v342_v31, %v342_v31 }
 0x153   :  { %v475_v35 = vadd.f32 %v474_v28, %v449_v30 }
 0x154   :  { %v496_v36 = vadd.f32 %v495_v32, %v450_v34 }
 0x156   :  { %v346_v37 = vpop.f32.mrb[12].mxu0 }
 0x157   :  { %v400_v38 = vadd.f32 %v399_v29, %v346_v37  ;;  %v451_v39 = vmul.f32 %v346_v37, %v346_v37  ;;  %v348_v40 = vpop.f32.mrb[13].mxu0 }
 0x158   :  { %v421_v41 = vadd.f32 %v420_v33, %v348_v40  ;;  %v452_v42 = vmul.f32 %v348_v40, %v348_v40  ;;  %v350_v43 = vpop.f32.mrb[14].mxu0 }
 0x159   :  { %v476_v44 = vadd.f32 %v475_v35, %v451_v39  ;;  %v401_v45 = vadd.f32 %v400_v38, %v350_v43  ;;  %v453_v46 = vmul.f32 %v350_v43, %v350_v43  ;;  %v352_v47 = vpop.f32.mrb[15].mxu0 }
 0x15a   :  { %v497_v48 = vadd.f32 %v496_v36, %v452_v42  ;;  %v422_v49 = vadd.f32 %v421_v41, %v352_v47  ;;  %v454_v50 = vmul.f32 %v352_v47, %v352_v47 }
 0x15b   :  { %v477_v51 = vadd.f32 %v476_v44, %v453_v46 }
 0x15c   :  { %v498_v52 = vadd.f32 %v497_v48, %v454_v50 }
 0x15e   :  { %v356_v53 = vpop.f32.mrb[16].mxu0 }
 0x15f   :  { %v402_v54 = vadd.f32 %v401_v45, %v356_v53  ;;  %v455_v55 = vmul.f32 %v356_v53, %v356_v53  ;;  %v358_v56 = vpop.f32.mrb[17].mxu0 }
 0x160   :  { %v423_v59 = vadd.f32 %v422_v49, %v358_v56  ;;  %v456_v60 = vmul.f32 %v358_v56, %v358_v56  ;;  %v360_v61 = vpop.f32.mrb[18].mxu0 }
 0x161   :  { %v478_v62 = vadd.f32 %v477_v51, %v455_v55  ;;  %v403_v63 = vadd.f32 %v402_v54, %v360_v61  ;;  %v457_v0 = vmul.f32 %v360_v61, %v360_v61  ;;  %v362_v1 = vpop.f32.mrb[19].mxu0 }
 0x162   :  { %v499_v2 = vadd.f32 %v498_v52, %v456_v60  ;;  %v424_v3 = vadd.f32 %v423_v59, %v362_v1  ;;  %v458_v4 = vmul.f32 %v362_v1, %v362_v1 }
 0x163   :  { %v479_v5 = vadd.f32 %v478_v62, %v457_v0 }
 0x164   :  { %v500_v6 = vadd.f32 %v499_v2, %v458_v4 }
 0x166   :  { %v366_v7 = vpop.f32.mrb[20].mxu0 }
 0x167   :  { %v404_v8 = vadd.f32 %v403_v63, %v366_v7  ;;  %v459_v9 = vmul.f32 %v366_v7, %v366_v7  ;;  %v368_v10 = vpop.f32.mrb[21].mxu0 }
 0x168   :  { %v425_v11 = vadd.f32 %v424_v3, %v368_v10  ;;  %v460_v12 = vmul.f32 %v368_v10, %v368_v10  ;;  %v370_v13 = vpop.f32.mrb[22].mxu0 }
 0x169   :  { %v480_v14 = vadd.f32 %v479_v5, %v459_v9  ;;  %v405_v15 = vadd.f32 %v404_v8, %v370_v13  ;;  %v461_v16 = vmul.f32 %v370_v13, %v370_v13  ;;  %v372_v17 = vpop.f32.mrb[23].mxu0 }
 0x16a   :  { %v501_v18 = vadd.f32 %v500_v6, %v460_v12  ;;  %v426_v19 = vadd.f32 %v425_v11, %v372_v17  ;;  %v462_v20 = vmul.f32 %v372_v17, %v372_v17 }
 0x16b   :  { %v481_v21 = vadd.f32 %v480_v14, %v461_v16 }
 0x16c   :  { %v502_v22 = vadd.f32 %v501_v18, %v462_v20 }
 0x16e   :  { %v376_v23 = vpop.f32.mrb[24].mxu0 }
 0x16f   :  { %v406_v24 = vadd.f32 %v405_v15, %v376_v23  ;;  %v463_v25 = vmul.f32 %v376_v23, %v376_v23  ;;  %v378_v26 = vpop.f32.mrb[25].mxu0 }
 0x170   :  { %v427_v27 = vadd.f32 %v426_v19, %v378_v26  ;;  %v464_v28 = vmul.f32 %v378_v26, %v378_v26  ;;  %v380_v29 = vpop.f32.mrb[26].mxu0 }
 0x171   :  { %v482_v30 = vadd.f32 %v481_v21, %v463_v25  ;;  %v407_v31 = vadd.f32 %v406_v24, %v380_v29  ;;  %v465_v32 = vmul.f32 %v380_v29, %v380_v29  ;;  %v382_v33 = vpop.f32.mrb[27].mxu0  ;;  %v2072_v29 = vmov 1966171168  }
 0x172   :  { %v503_v34 = vadd.f32 %v502_v22, %v464_v28  ;;  %v428_v35 = vadd.f32 %v427_v27, %v382_v33  ;;  %v466_v36 = vmul.f32 %v382_v33, %v382_v33 }
 0x173   :  { %v483_v37 = vadd.f32 %v482_v30, %v465_v32  ;;  %v530_v30 = vunpack.c.l.s4 %v2072_v29 }
 0x174   :  { %v504_v38 = vadd.f32 %v503_v34, %v466_v36 }
 0x175   :  { %v531_v32 = vunpack.c.0.s8 %v530_v30 }
 0x176   :  { %v386_v39 = vpop.f32.mrb[28].mxu0 }
 0x177   :  { %v408_v40 = vadd.f32 %v407_v31, %v386_v39  ;;  %v467_v41 = vmul.f32 %v386_v39, %v386_v39  ;;  %v388_v42 = vpop.f32.mrb[29].mxu0  ;;  %v532_v31 = vlaneseq  ;;  %v521_v39 = vld [vmem:[%s2321_s2] sm:$0x3] }
 0x178   :  { %v429_v43 = vadd.f32 %v428_v35, %v388_v42  ;;  %v468_v44 = vmul.f32 %v388_v42, %v388_v42  ;;  %v390_v45 = vpop.f32.mrb[30].mxu0 }
 0x179   :  { %v484_v46 = vadd.f32 %v483_v37, %v467_v41  ;;  %v409_v47 = vadd.f32 %v408_v40, %v390_v45  ;;  %v469_v48 = vmul.f32 %v390_v45, %v390_v45  ;;  %v392_v49 = vpop.f32.mrb[31].mxu0  ;;  %v533_v33 = vshrl.u32 %v532_v31, 7 }
 0x17a   :  { %v505_v50 = vadd.f32 %v504_v38, %v468_v44  ;;  %v430_v51 = vadd.f32 %v429_v43, %v392_v49  ;;  %v470_v52 = vmul.f32 %v392_v49, %v392_v49 }
 0x17b   :  { %v410_v53 = vrot.slane %v409_v47, 4  ;;  %v485_v54 = vadd.f32 %v484_v46, %v469_v48  ;;  %v2203_v35 = vsub.s32 %v531_v32, %v533_v33  ;;  %v2210_v41 = vsub.s32 0, %v533_v33 }
 0x17c   :  { %v431_v55 = vrot.slane %v430_v51, 4  ;;  %v506_v56 = vadd.f32 %v505_v50, %v470_v52  ;;  %v2212_v42 = vsub.s32 1, %v533_v33  ;;  %v545_v52 = vld [vmem:[%s2322_s3] sm:$0x3] }
 0x17d   :  { %v411_v59 = vadd.f32 %v410_v53, %v409_v47  ;;  %v486_v60 = vrot.slane %v485_v54, 4 }
 0x17e   :  { %v432_v61 = vadd.f32 %v431_v55, %v430_v51  ;;  %v507_v62 = vrot.slane %v506_v56, 4 }
 0x17f   :  { %v412_v63 = vrot.slane %v411_v59, 2  ;;  %v487_v0 = vadd.f32 %v486_v60, %v485_v54 }
 0x180   :  { %v433_v1 = vrot.slane %v432_v61, 2  ;;  %v508_v2 = vadd.f32 %v507_v62, %v506_v56  ;;  %v2073_v62 = vmov 0.0  }
 0x181   :  { %v413_v3 = vadd.f32 %v412_v63, %v411_v59  ;;  %v488_v4 = vrot.slane %v487_v0, 2 }
 0x182   :  { %v434_v5 = vadd.f32 %v433_v1, %v432_v61  ;;  %v509_v6 = vrot.slane %v508_v2, 2  ;;  %v1921_v1 = vld [vmem:[#allocation8 + $0x40] sm:$0xff]  }
 0x183   :  { %v414_v7 = vrot.slane %v413_v3, 1  ;;  %v489_v8 = vadd.f32 %v488_v4, %v487_v0  ;;  %v2074_v0 = vmov 0.0|0.0   ;;  %1748 = vmatprep.subr.bf16.mxu0 %v1921_v1  ;;  %1812 = vmatprep.subr.bf16.mxu1 %v1921_v1  ;;  %v1924_v4 = vld [vmem:[#allocation8 + $0x8] sm:$0xff]  }
 0x184   :  { %v435_v9 = vrot.slane %v434_v5, 1  ;;  %v510_v10 = vadd.f32 %v509_v6, %v508_v2  ;;  %v1922_v2 = vld [vmem:[#allocation8] sm:$0xff]   ;;  %v1926_v6 = vld [vmem:[#allocation8 + $0x10] sm:$0xff]  }
 0x185   :  { %v415_v11 = vadd.f32 %v414_v7, %v413_v3  ;;  %v490_v12 = vrot.slane %v489_v8, 1  ;;  %1749 = vmatpush3.bf16.msra.mxu0 %v1922_v2  ;;  %v1923_v3 = vld [vmem:[#allocation8 + $0x48] sm:$0xff]   ;;  %v1927_v7 = vld [vmem:[#allocation8 + $0x58] sm:$0xff]  }
 0x186   :  { %v436_v13 = vadd.f32 %v435_v9, %v434_v5  ;;  %v511_v14 = vrot.slane %v510_v10, 1  ;;  %1750 = vmatprep.subr.bf16.mxu0 %v1923_v3  ;;  %v1925_v5 = vld [vmem:[#allocation8 + $0x50] sm:$0xff]   ;;  %v1929_v9 = vld [vmem:[#allocation8 + $0x60] sm:$0xff]  }
 0x187   :  { %v437_v15 = vmul.f32 0.125, %v415_v11  ;;  %v491_v16 = vadd.f32 %v490_v12, %v489_v8  ;;  %v1928_v8 = vld [vmem:[#allocation8 + $0x18] sm:$0xff]   ;;  %v1931_v11 = vld [vmem:[#allocation8 + $0x68] sm:$0xff]  }
 0x188   :  { %v438_v17 = vmul.f32 0.125, %v436_v13  ;;  %v512_v18 = vadd.f32 %v511_v14, %v510_v10  ;;  %v1930_v10 = vld [vmem:[#allocation8 + $0x20] sm:$0xff]   ;;  %v1932_v12 = vld [vmem:[#allocation8 + $0x28] sm:$0xff]   ;;  %v1933_v13 = vld [vmem:[#allocation8 + $0x70] sm:$0xff]  }
 0x189   :  { %v513_v19 = vmul.f32 0.125, %v491_v16  ;;  %v515_v20 = vmul.f32 %v437_v15, %v437_v15  ;;  %1751 = vmatpush3.bf16.msra.mxu0 %v1924_v4  ;;  %v1934_v14 = vld [vmem:[#allocation8 + $0x30] sm:$0xff]   ;;  %v1936_v16 = vld [vmem:[#allocation8 + $0x38] sm:$0xff]  }
 0x18a   :  { %v514_v21 = vmul.f32 0.125, %v512_v18  ;;  %v516_v22 = vmul.f32 %v438_v17, %v438_v17  ;;  %1752 = vmatprep.subr.bf16.mxu0 %v1925_v5 }
 0x18b   :  { %v517_v23 = vsub.f32 %v513_v19, %v515_v20 }
 0x18c   :  { %v518_v24 = vsub.f32 %v514_v21, %v516_v22 }
 0x18d   :  { %v519_v25 = vmax.f32 %v517_v23, 0.0  ;;  %1753 = vmatpush3.bf16.msra.mxu0 %v1926_v6 }
 0x18e   :  { %v520_v26 = vmax.f32 %v518_v24, 0.0  ;;  %1754 = vmatprep.subr.bf16.mxu0 %v1927_v7 }
 0x18f   :  { %v522_v27 = vadd.f32 1e-05, %v519_v25 }
 0x190   :  { %v523_v28 = vadd.f32 1e-05, %v520_v26 }
 0x191   :  { %1937 = vrsqrt.f32 %v522_v27  ;;  %1755 = vmatpush3.bf16.msra.mxu0 %v1928_v8 }
 0x192   :  { %1939 = vrsqrt.f32 %v523_v28  ;;  %1756 = vmatprep.subr.bf16.mxu0 %v1929_v9 }
 0x195   :  { %1757 = vmatpush3.bf16.msra.mxu0 %v1930_v10 }
 0x196   :  { %1758 = vmatprep.subr.bf16.mxu0 %v1931_v11 }
 0x199   :  { %1759 = vmatpush3.bf16.msra.mxu0 %v1932_v12 }
 0x19a   :  { %1760 = vmatprep.subr.bf16.mxu0 %v1933_v13 }
 0x19b   :  { %v1938_v34 = vpop.eup %1937 }
 0x19c   :  { %v1940_v36 = vpop.eup %1939 }
 0x19d   :  { %v528_v37 = vcombine.low %v1938_v34, %v1940_v36  ;;  %1761 = vmatpush3.bf16.msra.mxu0 %v1934_v14 }
 0x19f   :  { %v535_v38 = vrot.slane %v528_v37, %v2203_v35 }
 0x1a1   :  { %v542_v40 = vrot.slane %v535_v38, %v2203_v35 }
 0x1a3   :  { %v544_v43 = vmul.f32 %v542_v40, %v521_v39 }
 0x1a5   :  { %v550_v44 = vrot.slane %v544_v43, %v2210_v41  ;;  %v554_v45 = vrot.slane %v544_v43, %v2212_v42 }
 0x1a7   :  { %v557_v46 = vmul.f32 %v550_v44, %v437_v15  ;;  %v558_v47 = vmul.f32 %v554_v45, %v438_v17  ;;  %v579_v48 = vmul.f32 %v554_v45, %v2195_v58  ;;  %v578_v49 = vmul.f32 %v550_v44, %v2193_v57  ;;  %v1935_v15 = vld [vmem:[#allocation8 + $0x78] sm:$0xff]  }
 0x1a8   :  { %1762 = vmatprep.subr.bf16.mxu0 %v1935_v15 }
 0x1a9   :  { %v561_v50 = vcombine.low %v557_v46, %v558_v47  ;;  %1763 = vmatpush3.bf16.msra.mxu0 %v1936_v16 }
 0x1ab   :  { %v568_v51 = vrot.slane %v561_v50, %v2203_v35 }
 0x1ad   :  { %v575_v53 = vrot.slane %v568_v51, %v2203_v35 }
 0x1af   :  { %v577_v54 = vsub.f32 %v545_v52, %v575_v53 }
 0x1b1   :  { %v618_v55 = vrot.slane %v577_v54, %v2212_v42  ;;  %v614_v56 = vrot.slane %v577_v54, %v2210_v41 }
 0x1b3   :  { %v622_v59 = vadd.f32 %v618_v55, %v579_v48  ;;  %v621_v60 = vadd.f32 %v614_v56, %v578_v49 }
 0x1b5   :  { %v654_v61 = vmax.f32 %v622_v59, 0.0  ;;  %v653_v58 = vmax.f32 %v621_v60, 0.0 }
 0x1b7   :  { %v750_v57 = vpack.c.bf16 %v2073_v62, %v654_v61  ;;  %v749_v63 = vpack.c.bf16 %v2073_v62, %v653_v58 }
 0x1b9   :  { %989 = vmatprep.mubr.bf16.mxu1 %v750_v57 }
 0x1ba   :  { %990 = vmatmul.mubr.bf16.vlgmr.msra.gmra.mrb[0].mxu1 %v749_v63 }
 0x1bb   :  { %999 = vmatprep.mubr.bf16.mxu1 %v2074_v0  ;;  %1820 = vmatpush3.bf16.msra.mxu1 %v1922_v2 }
 0x1bc   :  { %1813 = vmatprep.subr.bf16.mxu1 %v1923_v3 }
 0x1bf   :  { %1821 = vmatpush3.bf16.msra.mxu1 %v1924_v4 }
 0x1c0   :  { %1814 = vmatprep.subr.bf16.mxu1 %v1925_v5 }
 0x1c2   :  { %1000 = vmatmul.mubr.bf16.gmra.mrb[4].mxu1 %v2074_v0 }
 0x1c3   :  { %1009 = vmatprep.mubr.bf16.mxu1 %v2074_v0  ;;  %1822 = vmatpush3.bf16.msra.mxu1 %v1926_v6 }
 0x1c4   :  { %1815 = vmatprep.subr.bf16.mxu1 %v1927_v7 }
 0x1c7   :  { %1823 = vmatpush3.bf16.msra.mxu1 %v1928_v8 }
 0x1c8   :  { %1816 = vmatprep.subr.bf16.mxu1 %v1929_v9 }
 0x1ca   :  { %1010 = vmatmul.mubr.bf16.gmra.mrb[8].mxu1 %v2074_v0 }
 0x1cb   :  { %1019 = vmatprep.mubr.bf16.mxu1 %v2074_v0  ;;  %1824 = vmatpush3.bf16.msra.mxu1 %v1930_v10 }
 0x1cc   :  { %1817 = vmatprep.subr.bf16.mxu1 %v1931_v11 }
 0x1cf   :  { %1825 = vmatpush3.bf16.msra.mxu1 %v1932_v12 }
 0x1d0   :  { %1818 = vmatprep.subr.bf16.mxu1 %v1933_v13 }
 0x1d2   :  { %1020 = vmatmul.mubr.bf16.gmra.mrb[12].mxu1 %v2074_v0 }
 0x1d3   :  { %1029 = vmatprep.mubr.bf16.mxu1 %v2074_v0  ;;  %1826 = vmatpush3.bf16.msra.mxu1 %v1934_v14 }
 0x1d4   :  { %1819 = vmatprep.subr.bf16.mxu1 %v1935_v15 }
 0x1d7   :  { %1827 = vmatpush3.bf16.msra.mxu1 %v1936_v16 }
 0x1da   :  { %1030 = vmatmul.mubr.bf16.gmra.mrb[16].mxu1 %v2074_v0 }
 0x1db   :  { %1039 = vmatprep.mubr.bf16.mxu1 %v2074_v0 }
 0x1e2   :  { %1040 = vmatmul.mubr.bf16.gmra.mrb[20].mxu1 %v2074_v0 }
 0x1e3   :  { %1049 = vmatprep.mubr.bf16.mxu1 %v2074_v0 }
 0x1ea   :  { %1050 = vmatmul.mubr.bf16.gmra.mrb[24].mxu1 %v2074_v0 }
 0x1eb   :  { %1059 = vmatprep.mubr.bf16.mxu1 %v2074_v0 }
 0x1f2   :  { %1060 = vmatmul.mubr.bf16.gmra.mrb[28].mxu1 %v2074_v0 }
 0x1f3   :  { %1623 = vmatprep.mubr.bf16.mxu1 %v2074_v0 }
 0x1fa   :  { %1624 = vmatmul.mubr.bf16.vlgmr.msra.gmra.mrb[32].mxu1 %v2074_v0 }
 0x1fb   :  { %1631 = vmatprep.mubr.bf16.mxu1 %v2074_v0 }
 0x202   :  { %1632 = vmatmul.mubr.bf16.gmra.mrb[36].mxu1 %v2074_v0 }
 0x28d   :  { %v2244_v17 = vpop.f32.mrb[0].mxu1 }
 0x28e   :  { %v2246_v18 = vpop.f32.mrb[1].mxu1  ;;  %v1114_v20 = vmul.f32 %v2244_v17, %v2244_v17 }
 0x28f   :  { %v995_v19 = vpop.f32.mrb[2].mxu1  ;;  %v1115_v24 = vmul.f32 %v2246_v18, %v2246_v18 }
 0x290   :  { %v1070_v21 = vadd.f32 %v995_v19, %v2244_v17  ;;  %v1116_v22 = vmul.f32 %v995_v19, %v995_v19  ;;  %v997_v23 = vpop.f32.mrb[3].mxu1 }
 0x291   :  { %v1091_v25 = vadd.f32 %v997_v23, %v2246_v18  ;;  %v1117_v26 = vmul.f32 %v997_v23, %v997_v23 }
 0x292   :  { %v1146_v27 = vadd.f32 %v1116_v22, %v1114_v20 }
 0x293   :  { %v1167_v28 = vadd.f32 %v1117_v26, %v1115_v24 }
 0x295   :  { %v1001_v29 = vpop.f32.mrb[4].mxu1 }
 0x296   :  { %v1071_v30 = vadd.f32 %v1070_v21, %v1001_v29  ;;  %v1118_v31 = vmul.f32 %v1001_v29, %v1001_v29  ;;  %v1003_v32 = vpop.f32.mrb[5].mxu1 }
 0x297   :  { %v1092_v33 = vadd.f32 %v1091_v25, %v1003_v32  ;;  %v1119_v34 = vmul.f32 %v1003_v32, %v1003_v32  ;;  %v1005_v36 = vpop.f32.mrb[6].mxu1 }
 0x298   :  { %v1147_v37 = vadd.f32 %v1146_v27, %v1118_v31  ;;  %v1072_v38 = vadd.f32 %v1071_v30, %v1005_v36  ;;  %v1120_v39 = vmul.f32 %v1005_v36, %v1005_v36  ;;  %v1007_v40 = vpop.f32.mrb[7].mxu1 }
 0x299   :  { %v1168_v43 = vadd.f32 %v1167_v28, %v1119_v34  ;;  %v1093_v44 = vadd.f32 %v1092_v33, %v1007_v40  ;;  %v1121_v45 = vmul.f32 %v1007_v40, %v1007_v40 }
 0x29a   :  { %v1148_v46 = vadd.f32 %v1147_v37, %v1120_v39 }
 0x29b   :  { %v1169_v47 = vadd.f32 %v1168_v43, %v1121_v45 }
 0x29d   :  { %v1011_v48 = vpop.f32.mrb[8].mxu1 }
 0x29e   :  { %v1073_v49 = vadd.f32 %v1072_v38, %v1011_v48  ;;  %v1122_v50 = vmul.f32 %v1011_v48, %v1011_v48  ;;  %v1013_v51 = vpop.f32.mrb[9].mxu1 }
 0x29f   :  { %v1094_v52 = vadd.f32 %v1093_v44, %v1013_v51  ;;  %v1123_v53 = vmul.f32 %v1013_v51, %v1013_v51  ;;  %v1015_v54 = vpop.f32.mrb[10].mxu1 }
 0x2a0   :  { %v1149_v55 = vadd.f32 %v1148_v46, %v1122_v50  ;;  %v1074_v56 = vadd.f32 %v1073_v49, %v1015_v54  ;;  %v1124_v59 = vmul.f32 %v1015_v54, %v1015_v54  ;;  %v1017_v60 = vpop.f32.mrb[11].mxu1 }
 0x2a1   :  { %v1170_v61 = vadd.f32 %v1169_v47, %v1123_v53  ;;  %v1095_v58 = vadd.f32 %v1094_v52, %v1017_v60  ;;  %v1125_v57 = vmul.f32 %v1017_v60, %v1017_v60 }
 0x2a2   :  { %v1150_v63 = vadd.f32 %v1149_v55, %v1124_v59 }
 0x2a3   :  { %v1171_v1 = vadd.f32 %v1170_v61, %v1125_v57 }
 0x2a5   :  { %v1021_v2 = vpop.f32.mrb[12].mxu1 }
 0x2a6   :  { %v1075_v3 = vadd.f32 %v1074_v56, %v1021_v2  ;;  %v1126_v4 = vmul.f32 %v1021_v2, %v1021_v2  ;;  %v1023_v5 = vpop.f32.mrb[13].mxu1 }
 0x2a7   :  { %v1096_v6 = vadd.f32 %v1095_v58, %v1023_v5  ;;  %v1127_v7 = vmul.f32 %v1023_v5, %v1023_v5  ;;  %v1025_v8 = vpop.f32.mrb[14].mxu1 }
 0x2a8   :  { %v1151_v9 = vadd.f32 %v1150_v63, %v1126_v4  ;;  %v1076_v10 = vadd.f32 %v1075_v3, %v1025_v8  ;;  %v1128_v11 = vmul.f32 %v1025_v8, %v1025_v8  ;;  %v1027_v12 = vpop.f32.mrb[15].mxu1 }
 0x2a9   :  { %v1172_v13 = vadd.f32 %v1171_v1, %v1127_v7  ;;  %v1097_v14 = vadd.f32 %v1096_v6, %v1027_v12  ;;  %v1129_v15 = vmul.f32 %v1027_v12, %v1027_v12 }
 0x2aa   :  { %v1152_v16 = vadd.f32 %v1151_v9, %v1128_v11 }
 0x2ab   :  { %v1173_v19 = vadd.f32 %v1172_v13, %v1129_v15 }
 0x2ad   :  { %v1031_v20 = vpop.f32.mrb[16].mxu1 }
 0x2ae   :  { %v1077_v21 = vadd.f32 %v1076_v10, %v1031_v20  ;;  %v1130_v22 = vmul.f32 %v1031_v20, %v1031_v20  ;;  %v1033_v23 = vpop.f32.mrb[17].mxu1 }
 0x2af   :  { %v1098_v24 = vadd.f32 %v1097_v14, %v1033_v23  ;;  %v1131_v25 = vmul.f32 %v1033_v23, %v1033_v23  ;;  %v1035_v26 = vpop.f32.mrb[18].mxu1 }
 0x2b0   :  { %v1153_v27 = vadd.f32 %v1152_v16, %v1130_v22  ;;  %v1078_v28 = vadd.f32 %v1077_v21, %v1035_v26  ;;  %v1132_v29 = vmul.f32 %v1035_v26, %v1035_v26  ;;  %v1037_v30 = vpop.f32.mrb[19].mxu1 }
 0x2b1   :  { %v1174_v31 = vadd.f32 %v1173_v19, %v1131_v25  ;;  %v1099_v32 = vadd.f32 %v1098_v24, %v1037_v30  ;;  %v1133_v33 = vmul.f32 %v1037_v30, %v1037_v30 }
 0x2b2   :  { %v1154_v34 = vadd.f32 %v1153_v27, %v1132_v29 }
 0x2b3   :  { %v1175_v36 = vadd.f32 %v1174_v31, %v1133_v33 }
 0x2b5   :  { %v1041_v37 = vpop.f32.mrb[20].mxu1 }
 0x2b6   :  { %v1079_v38 = vadd.f32 %v1078_v28, %v1041_v37  ;;  %v1134_v39 = vmul.f32 %v1041_v37, %v1041_v37  ;;  %v1043_v40 = vpop.f32.mrb[21].mxu1 }
 0x2b7   :  { %v1100_v43 = vadd.f32 %v1099_v32, %v1043_v40  ;;  %v1135_v44 = vmul.f32 %v1043_v40, %v1043_v40  ;;  %v1045_v45 = vpop.f32.mrb[22].mxu1 }
 0x2b8   :  { %v1155_v46 = vadd.f32 %v1154_v34, %v1134_v39  ;;  %v1080_v47 = vadd.f32 %v1079_v38, %v1045_v45  ;;  %v1136_v48 = vmul.f32 %v1045_v45, %v1045_v45  ;;  %v1047_v49 = vpop.f32.mrb[23].mxu1 }
 0x2b9   :  { %v1176_v50 = vadd.f32 %v1175_v36, %v1135_v44  ;;  %v1101_v51 = vadd.f32 %v1100_v43, %v1047_v49  ;;  %v1137_v52 = vmul.f32 %v1047_v49, %v1047_v49 }
 0x2ba   :  { %v1156_v53 = vadd.f32 %v1155_v46, %v1136_v48 }
 0x2bb   :  { %v1177_v54 = vadd.f32 %v1176_v50, %v1137_v52 }
 0x2bd   :  { %v1051_v55 = vpop.f32.mrb[24].mxu1 }
 0x2be   :  { %v1081_v56 = vadd.f32 %v1080_v47, %v1051_v55  ;;  %v1138_v59 = vmul.f32 %v1051_v55, %v1051_v55  ;;  %v1053_v60 = vpop.f32.mrb[25].mxu1 }
 0x2bf   :  { %v1102_v61 = vadd.f32 %v1101_v51, %v1053_v60  ;;  %v1139_v58 = vmul.f32 %v1053_v60, %v1053_v60  ;;  %v1055_v57 = vpop.f32.mrb[26].mxu1 }
 0x2c0   :  { %v1157_v63 = vadd.f32 %v1156_v53, %v1138_v59  ;;  %v1082_v1 = vadd.f32 %v1081_v56, %v1055_v57  ;;  %v1140_v2 = vmul.f32 %v1055_v57, %v1055_v57  ;;  %v1057_v3 = vpop.f32.mrb[27].mxu1 }
 0x2c1   :  { %v1178_v4 = vadd.f32 %v1177_v54, %v1139_v58  ;;  %v1103_v5 = vadd.f32 %v1102_v61, %v1057_v3  ;;  %v1141_v6 = vmul.f32 %v1057_v3, %v1057_v3 }
 0x2c2   :  { %v1158_v7 = vadd.f32 %v1157_v63, %v1140_v2 }
 0x2c3   :  { %v1179_v8 = vadd.f32 %v1178_v4, %v1141_v6 }
 0x2c5   :  { %v1061_v9 = vpop.f32.mrb[28].mxu1 }
 0x2c6   :  { %v1083_v10 = vadd.f32 %v1082_v1, %v1061_v9  ;;  %v1142_v11 = vmul.f32 %v1061_v9, %v1061_v9  ;;  %v1063_v12 = vpop.f32.mrb[29].mxu1 }
 0x2c7   :  { %v1104_v13 = vadd.f32 %v1103_v5, %v1063_v12  ;;  %v1143_v14 = vmul.f32 %v1063_v12, %v1063_v12  ;;  %v1065_v15 = vpop.f32.mrb[30].mxu1 }
 0x2c8   :  { %v1159_v16 = vadd.f32 %v1158_v7, %v1142_v11  ;;  %v1084_v19 = vadd.f32 %v1083_v10, %v1065_v15  ;;  %v1144_v20 = vmul.f32 %v1065_v15, %v1065_v15  ;;  %v1067_v21 = vpop.f32.mrb[31].mxu1 }
 0x2c9   :  { %v1180_v22 = vadd.f32 %v1179_v8, %v1143_v14  ;;  %v1105_v23 = vadd.f32 %v1104_v13, %v1067_v21  ;;  %v1145_v24 = vmul.f32 %v1067_v21, %v1067_v21  ;;  %v1196_v8 = vld [vmem:[%s2324_s5] sm:$0x3] }
 0x2ca   :  { %v1085_v25 = vrot.slane %v1084_v19, 4  ;;  %v1160_v26 = vadd.f32 %v1159_v16, %v1144_v20  ;;  %v1220_v21 = vld [vmem:[%s2325_s6] sm:$0x3] }
 0x2cb   :  { %v1106_v27 = vrot.slane %v1105_v23, 4  ;;  %v1181_v28 = vadd.f32 %v1180_v22, %v1145_v24 }
 0x2cc   :  { %v1086_v29 = vadd.f32 %v1085_v25, %v1084_v19  ;;  %v1161_v30 = vrot.slane %v1160_v26, 4 }
 0x2cd   :  { %v1107_v31 = vadd.f32 %v1106_v27, %v1105_v23  ;;  %v1182_v32 = vrot.slane %v1181_v28, 4 }
 0x2ce   :  { %v1087_v33 = vrot.slane %v1086_v29, 2  ;;  %v1162_v34 = vadd.f32 %v1161_v30, %v1160_v26 }
 0x2cf   :  { %v1108_v36 = vrot.slane %v1107_v31, 2  ;;  %v1183_v37 = vadd.f32 %v1182_v32, %v1181_v28 }
 0x2d0   :  { %v1088_v38 = vadd.f32 %v1087_v33, %v1086_v29  ;;  %v1163_v39 = vrot.slane %v1162_v34, 2 }
 0x2d1   :  { %v1109_v40 = vadd.f32 %v1108_v36, %v1107_v31  ;;  %v1184_v43 = vrot.slane %v1183_v37, 2  ;;  %v2286_v31 = vld [vmem:[%s2327_s8] ss:$0 sm:$0xff]  ;;  %s2075_s8 = smov [#allocation10]  }
 0x2d2   :  { %v1089_v44 = vrot.slane %v1088_v38, 1  ;;  %v1164_v45 = vadd.f32 %v1163_v39, %v1162_v34  ;;  %s1661_s25 = sshll.u32 %s2075_s8, 4  ;;  %s1662_s25 = int_to_ptr.vmem [resolvable:$true] %s1661_s25 }
 0x2d3   :  { %v1110_v46 = vrot.slane %v1109_v40, 1  ;;  %v1185_v47 = vadd.f32 %v1184_v43, %v1183_v37  ;;  %s2033_s26 = scalar_lea.vmem %s1662_s25, 2048  ;;  %p2038_p5 = scmp.lt.s32.totalorder %s1662_s25, %s1662_s25 }
 0x2d4   :  { %v1090_v48 = vadd.f32 %v1089_v44, %v1088_v38  ;;  %v1165_v49 = vrot.slane %v1164_v45, 1  ;;  %p2034_p4 = scmp.ne.s32.totalorder %s1662_s25, %s2033_s26  ;;  %p2039_p6 = scmp.lt.s32.totalorder %s2033_s26, %s2033_s26 }
 0x2d5   :  { %v1111_v50 = vadd.f32 %v1110_v46, %v1109_v40  ;;  %v1186_v51 = vrot.slane %v1185_v47, 1 }
 0x2d6   :  { %v1112_v52 = vmul.f32 0.125, %v1090_v48  ;;  %v1166_v53 = vadd.f32 %v1165_v49, %v1164_v45  ;;  %p2040_p7 = por %p2039_p6, %p2038_p5 }
 0x2d7   :  { %v1113_v54 = vmul.f32 0.125, %v1111_v50  ;;  %v1187_v55 = vadd.f32 %v1186_v51, %v1185_v47 }
 0x2d8   :  { %v1188_v56 = vmul.f32 0.125, %v1166_v53  ;;  %v1190_v59 = vmul.f32 %v1112_v52, %v1112_v52  ;;  %p2041_p8 = pnand %p2040_p7, %p2034_p4 }
 0x2d9   :  { %v1189_v60 = vmul.f32 0.125, %v1187_v55  ;;  %v1191_v61 = vmul.f32 %v1113_v54, %v1113_v54 }
 0x2da   :  { %v1192_v58 = vsub.f32 %v1188_v56, %v1190_v59 }
 0x2db   :  { %v1193_v57 = vsub.f32 %v1189_v60, %v1191_v61 }
 0x2dc   :  { %v1194_v63 = vmax.f32 %v1192_v58, 0.0 }
 0x2dd   :  { %v1195_v1 = vmax.f32 %v1193_v57, 0.0 }
 0x2de   :  { %v1197_v2 = vadd.f32 1e-05, %v1194_v63 }
 0x2df   :  { %v1198_v3 = vadd.f32 1e-05, %v1195_v1 }
 0x2e0   :  { %1941 = vrsqrt.f32 %v1197_v2 }
 0x2e1   :  { %1943 = vrsqrt.f32 %v1198_v3 }
 0x2ea   :  { %v1942_v4 = vpop.eup %1941 }
 0x2eb   :  { %v1944_v5 = vpop.eup %1943 }
 0x2ec   :  { %v1203_v6 = vcombine.low %v1942_v4, %v1944_v5 }
 0x2ee   :  { %v1210_v7 = vrot.slane %v1203_v6, %v2203_v35 }
 0x2f0   :  { %v1217_v9 = vrot.slane %v1210_v7, %v2203_v35 }
 0x2f2   :  { %v1219_v10 = vmul.f32 %v1217_v9, %v1196_v8 }
 0x2f4   :  { %v1225_v11 = vrot.slane %v1219_v10, %v2210_v41  ;;  %v1229_v12 = vrot.slane %v1219_v10, %v2212_v42 }
 0x2f6   :  { %v1232_v13 = vmul.f32 %v1225_v11, %v1112_v52  ;;  %v1233_v14 = vmul.f32 %v1229_v12, %v1113_v54  ;;  %v1254_v15 = vmul.f32 %v1229_v12, %v2246_v18  ;;  %v1253_v16 = vmul.f32 %v1225_v11, %v2244_v17 }
 0x2f8   :  { %v1236_v19 = vcombine.low %v1232_v13, %v1233_v14 }
 0x2fa   :  { %v1243_v20 = vrot.slane %v1236_v19, %v2203_v35 }
 0x2fc   :  { %v1250_v22 = vrot.slane %v1243_v20, %v2203_v35  ;;  %v1800_v35 = vpop.f32.mrb[32].mxu1 }
 0x2fe   :  { %v1252_v23 = vsub.f32 %v1220_v21, %v1250_v22 }
 0x300   :  { %v1289_v24 = vrot.slane %v1252_v23, %v2210_v41  ;;  %v1293_v25 = vrot.slane %v1252_v23, %v2212_v42  ;;  %v1801_v41 = vpop.f32.mrb[33].mxu1 }
 0x301   :  { %v1803_v42 = vpop.f32.mrb[34].mxu1 }
 0x302   :  { %v1297_v26 = vadd.f32 %v1293_v25, %v1254_v15  ;;  %v1296_v27 = vadd.f32 %v1289_v24, %v1253_v16  ;;  %v1804_v30 = vpop.f32.mrb[35].mxu1 }
 0x303   :  { %v1805_v32 = vadd.f32 %v1804_v30, %v1803_v42  ;;  %v1806_v36 = vpop.f32.mrb[36].mxu1 }
 0x304   :  { %v1329_v28 = vmax.f32 %v1297_v26, 0.0  ;;  %v1328_v18 = vmax.f32 %v1296_v27, 0.0  ;;  %v1807_v37 = vpop.f32.mrb[37].mxu1 }
 0x305   :  { %v1629_v34 = vadd.f32 %v1805_v32, %v2286_v31  ;;  %v1808_v38 = vadd.f32 %v1807_v37, %v1806_v36 }
 0x306   :  { %v1393_v17 = vpack.c.bf16 %v2073_v62, %v1329_v28  ;;  %v1392_v29 = vpack.c.bf16 %v2073_v62, %v1328_v18  ;;  %v1802_v62 = vadd.f32 %v1801_v41, %v1800_v35 }
 0x307   :  { %1653 = vst [vmem:[#allocation10 + $0x68] sm:$0xff] %v1629_v34  ;;  %v1634_v43 = vadd.f32 %v1808_v38, %v2286_v31 }
 0x308   :  { %1575 = vmatprep.mubr.bf16.mxu0 %v1393_v17  ;;  %v1626_v33 = vadd.f32 %v1802_v62, %v2286_v31 }
 0x309   :  { %1576 = vmatmul.mubr.bf16.vlgmr.msra.gmra.mrb[32].mxu0 %v1392_v29  ;;  %1654 = vst [vmem:[#allocation10 + $0x70] sm:$0xff] %v1634_v43 }
 0x30a   :  { %1583 = vmatprep.mubr.bf16.mxu0 %v2074_v0  ;;  %1652 = vst [vmem:[#allocation10 + $0x60] sm:$0xff] %v1626_v33 }
 0x311   :  { %1584 = vmatmul.mubr.bf16.gmra.mrb[36].mxu0 %v2074_v0 }
 0x312   :  { %1591 = vmatprep.mubr.bf16.mxu0 %v2074_v0 }
 0x319   :  { %1592 = vmatmul.mubr.bf16.gmra.mrb[40].mxu0 %v2074_v0 }
 0x31a   :  { %1599 = vmatprep.mubr.bf16.mxu0 %v2074_v0 }
 0x321   :  { %1600 = vmatmul.mubr.bf16.gmra.mrb[44].mxu0 %v2074_v0 }
 0x322   :  { %1607 = vmatprep.mubr.bf16.mxu0 %v2074_v0 }
 0x329   :  { %1608 = vmatmul.mubr.bf16.gmra.mrb[48].mxu0 %v2074_v0 }
 0x32a   :  { %1615 = vmatprep.mubr.bf16.mxu0 %v2074_v0 }
 0x331   :  { %1616 = vmatmul.mubr.bf16.gmra.mrb[52].mxu0 %v2074_v0  ;;  %v1809_v0 = vpop.f32.mrb[38].mxu1 }
 0x332   :  { %v1810_v39 = vpop.f32.mrb[39].mxu1 }
 0x333   :  { %v1811_v40 = vadd.f32 %v1810_v39, %v1809_v0 }
 0x335   :  { %v1637_v44 = vadd.f32 %v1811_v40, %v2286_v31 }
 0x337   :  { %1655 = vst [vmem:[#allocation10 + $0x78] sm:$0xff] %v1637_v44 }
 0x3dc   :  { %v1764_v45 = vpop.f32.mrb[32].mxu0 }
 0x3dd   :  { %v1765_v46 = vpop.f32.mrb[33].mxu0 }
 0x3de   :  { %v1766_v47 = vadd.f32 %v1765_v46, %v1764_v45  ;;  %v1767_v48 = vpop.f32.mrb[34].mxu0 }
 0x3df   :  { %v1768_v49 = vpop.f32.mrb[35].mxu0 }
 0x3e0   :  { %v1578_v50 = vadd.f32 %v1766_v47, %v2286_v31  ;;  %v1769_v51 = vadd.f32 %v1768_v49, %v1767_v48 }
 0x3e2   :  { %1640 = vst [vmem:[#allocation10] sm:$0xff] %v1578_v50  ;;  %v1581_v52 = vadd.f32 %v1769_v51, %v2286_v31 }
 0x3e4   :  { %1641 = vst [vmem:[#allocation10 + $0x8] sm:$0xff] %v1581_v52  ;;  %v1770_v53 = vpop.f32.mrb[36].mxu0 }
 0x3e5   :  { %v1771_v54 = vpop.f32.mrb[37].mxu0 }
 0x3e6   :  { %v1772_v55 = vadd.f32 %v1771_v54, %v1770_v53  ;;  %v1773_v56 = vpop.f32.mrb[38].mxu0 }
 0x3e7   :  { %v1774_v59 = vpop.f32.mrb[39].mxu0 }
 0x3e8   :  { %v1586_v60 = vadd.f32 %v1772_v55, %v2286_v31  ;;  %v1775_v61 = vadd.f32 %v1774_v59, %v1773_v56 }
 0x3ea   :  { %1642 = vst [vmem:[#allocation10 + $0x10] sm:$0xff] %v1586_v60  ;;  %v1589_v58 = vadd.f32 %v1775_v61, %v2286_v31 }
 0x3ec   :  { %1643 = vst [vmem:[#allocation10 + $0x18] sm:$0xff] %v1589_v58  ;;  %v1776_v57 = vpop.f32.mrb[40].mxu0 }
 0x3ed   :  { %v1777_v63 = vpop.f32.mrb[41].mxu0 }
 0x3ee   :  { %v1778_v1 = vadd.f32 %v1777_v63, %v1776_v57  ;;  %v1779_v2 = vpop.f32.mrb[42].mxu0 }
 0x3ef   :  { %v1780_v3 = vpop.f32.mrb[43].mxu0 }
 0x3f0   :  { %v1594_v4 = vadd.f32 %v1778_v1, %v2286_v31  ;;  %v1781_v5 = vadd.f32 %v1780_v3, %v1779_v2 }
 0x3f2   :  { %1644 = vst [vmem:[#allocation10 + $0x20] sm:$0xff] %v1594_v4  ;;  %v1597_v6 = vadd.f32 %v1781_v5, %v2286_v31 }
 0x3f4   :  { %1645 = vst [vmem:[#allocation10 + $0x28] sm:$0xff] %v1597_v6  ;;  %v1782_v7 = vpop.f32.mrb[44].mxu0 }
 0x3f5   :  { %v1783_v8 = vpop.f32.mrb[45].mxu0 }
 0x3f6   :  { %v1784_v9 = vadd.f32 %v1783_v8, %v1782_v7  ;;  %v1785_v10 = vpop.f32.mrb[46].mxu0 }
 0x3f7   :  { %v1786_v11 = vpop.f32.mrb[47].mxu0 }
 0x3f8   :  { %v1602_v12 = vadd.f32 %v1784_v9, %v2286_v31  ;;  %v1787_v13 = vadd.f32 %v1786_v11, %v1785_v10 }
 0x3fa   :  { %1646 = vst [vmem:[#allocation10 + $0x30] sm:$0xff] %v1602_v12  ;;  %v1605_v14 = vadd.f32 %v1787_v13, %v2286_v31 }
 0x3fc   :  { %1647 = vst [vmem:[#allocation10 + $0x38] sm:$0xff] %v1605_v14  ;;  %v1788_v15 = vpop.f32.mrb[48].mxu0 }
 0x3fd   :  { %v1789_v16 = vpop.f32.mrb[49].mxu0 }
 0x3fe   :  { %v1790_v19 = vadd.f32 %v1789_v16, %v1788_v15  ;;  %v1791_v20 = vpop.f32.mrb[50].mxu0 }
 0x3ff   :  { %v1792_v21 = vpop.f32.mrb[51].mxu0 }
 0x400   :  { %v1610_v22 = vadd.f32 %v1790_v19, %v2286_v31  ;;  %v1793_v23 = vadd.f32 %v1792_v21, %v1791_v20 }
 0x402   :  { %1648 = vst [vmem:[#allocation10 + $0x40] sm:$0xff] %v1610_v22  ;;  %v1613_v24 = vadd.f32 %v1793_v23, %v2286_v31 }
 0x404   :  { %1649 = vst [vmem:[#allocation10 + $0x48] sm:$0xff] %v1613_v24  ;;  %v1794_v25 = vpop.f32.mrb[52].mxu0 }
 0x405   :  { %v1795_v26 = vpop.f32.mrb[53].mxu0 }
 0x406   :  { %v1796_v27 = vadd.f32 %v1795_v26, %v1794_v25  ;;  %v1797_v28 = vpop.f32.mrb[54].mxu0 }
 0x407   :  { %v1798_v18 = vpop.f32.mrb[55].mxu0 }
 0x408   :  { %v1618_v17 = vadd.f32 %v1796_v27, %v2286_v31  ;;  %v1799_v29 = vadd.f32 %v1798_v18, %v1797_v28 }
 0x40a   :  { %1650 = vst [vmem:[#allocation10 + $0x50] sm:$0xff] %v1618_v17  ;;  %v1621_v35 = vadd.f32 %v1799_v29, %v2286_v31 }
 0x40c   :  { %1651 = vst [vmem:[#allocation10 + $0x58] sm:$0xff] %v1621_v35 }
 0x40d   :  { %2044 = shalt.err (!%p2041_p8)
}
 0x40e   :  { %s2045_s0 = scalar_lea.hbm %s2328_s9, 2048 }
 0x40f   :  { %p2046_p9 = scmp.ne.s32.totalorder %s2328_s9, %s2045_s0  ;;  %p2049_p10 = scmp.lt.u32.totalorder %s2045_s0, %s2328_s9 }
 0x411   :  { %p2051_p11 = pnand %p2049_p10, %p2046_p9 }
 0x413   :  { %2054 = shalt.err (!%p2051_p11)
}
 0x414   :  { %1667 = dma.vmem_to_hbm [thread:$0]  %s1662_s25, 2048, %s2328_s9, [#allocation4], %s2064_s19, %s2064_s19, %s2065_s20  }
 0x415   :  { %2061 = dma.done.wait [#allocation4], 2048  }
 0x416   :  { %2062 = vsyncadd [#allocation4], 4294965248 }
 0x417   :  { %1671 = vsyncpa [#allocation3], 1 }
 0x418   :  { %1672 = vsyncpa [#allocation6], 1 }
 0x419   :  { %1673 = vsyncpa [#allocation9], 1 }
 0x41a   :  { %1674 = vsyncpa [#allocation4], 1 }

</bundles_post_ra>
